<compile_context>
chip_gen: v7x
topology: tpu7x:2x2x1
jax: 0.10.0
libtpu: 0.0.40
codegen_flags: <defaults>
</compile_context>

<pallas_src>
import math
from functools import partial

import jax
import jax.numpy as jnp
from jax.experimental import pallas as pl
from jax.experimental.pallas import tpu as pltpu


def fnetwork_kernel(x_ref, w_ref, b_ref, o_ref, *, n_layers):
    # ---- pixel_norm over the feature axis (f32 on the VPU) ----
    x = x_ref[...].astype(jnp.float32)                       # (TB, D)
    ms = jnp.mean(x * x, axis=1, keepdims=True)              # (TB, 1)
    x = x * jax.lax.rsqrt(ms + 1e-8)

    # ---- n_layers equalized-LR linears (lr scale pre-folded into w_ref) ----
    # Whole parameter stack is VMEM-resident (single-buffered); the layer loop
    # is unrolled and each matmul hits the MXU with bf16 operands + f32 acc.
    for i in range(n_layers):
        b = b_ref[i : i + 1, :]                               # (1, D) f32, static slice (free)
        x = jnp.dot(x.astype(w_ref.dtype), w_ref[i],
                    preferred_element_type=jnp.float32) + b
        if i != n_layers - 1:
            x = jnp.maximum(x, 0.2 * x)                       # leaky_relu(0.2)

    o_ref[...] = x.astype(o_ref.dtype)


def prepare_fnetwork_params(w_stack, b_stack, latent_size):
    """One-time (module-init) prep: fold the equalized-LR constant c = sqrt(2/in)
    into the weights and cast them to bf16 for the MXU; keep biases f32."""
    c = math.sqrt(2.0 / latent_size)                          # LinearNormalizedLR constant
    w_prep = (w_stack.astype(jnp.float32) * c).astype(jnp.bfloat16)   # (L, D_in, D_out)
    b_prep = b_stack.astype(jnp.float32)                               # (L, D)
    return w_prep, b_prep


def _round_up(x, m):
    return ((x + m - 1) // m) * m


def _choose_batch_tiling(B, block_b):
    """Pick (tile, padded_B, n_steps):
       - sublane-aligned (multiple of 8) batch tile,
       - tile capped near block_b (amortizes the ~0.35 us per-step overhead),
       - >= 2 grid steps whenever B allows it (v7x megacore gets both cores busy),
       - padding limited to < 8 rows per grid step (no large padded-work waste)."""
    Bp = _round_up(max(B, 1), 8)
    n_steps = max(pl.cdiv(Bp, block_b), 2 if Bp >= 16 else 1)
    tb = _round_up(pl.cdiv(Bp, n_steps), 8)
    Bp = tb * n_steps
    return tb, Bp, n_steps


def fnetwork_forward(x, w_prep, b_prep, latent_size, n_layers, *, block_b=1024):
    """x: (B, latent_size) f32. Returns (B, latent_size, 1, 1) like the PyTorch module."""
    B, D = x.shape
    assert D == latent_size
    L = n_layers

    tb, Bp, n_steps = _choose_batch_tiling(B, block_b)
    pad = Bp - B
    x_in = jnp.pad(x, ((0, pad), (0, 0))) if pad else x

    kernel = partial(fnetwork_kernel, n_layers=n_layers)

    # Advisory cost hint for XLA scheduling around the custom call.
    bytes_accessed = (
        Bp * D * 4            # x in (f32)
        + L * D * D * 2       # weights (bf16)
        + L * D * 4           # biases (f32)
        + Bp * D * 4          # out (f32)
    )
    cost = pl.CostEstimate(
        flops=2 * L * Bp * D * D,
        transcendentals=Bp,               # one rsqrt per row (pixel_norm)
        bytes_accessed=bytes_accessed,
    )

    out = pl.pallas_call(
        kernel,
        out_shape=jax.ShapeDtypeStruct((Bp, D), jnp.float32),
        grid=(n_steps,),
        in_specs=[
            # x tile walks the batch axis (double-buffered by default).
            pl.BlockSpec((tb, D), lambda i: (i, 0)),
            # Parameter stacks are grid-invariant: constant index_map + single
            # buffer so VMEM holds exactly one copy across all grid steps.
            pl.BlockSpec((L, D, D), lambda i: (0, 0, 0),
                         pipeline_mode=pl.Buffered(1)),
            pl.BlockSpec((L, D), lambda i: (0, 0),
                         pipeline_mode=pl.Buffered(1)),
        ],
        out_specs=pl.BlockSpec((tb, D), lambda i: (i, 0)),
        compiler_params=pltpu.CompilerParams(
            # batch tiles are independent -> megacore split on v7x
            dimension_semantics=("parallel",),
        ),
        cost_estimate=cost,
    )(x_in, w_prep, b_prep)

    if pad:
        out = out[:B]
    return out.reshape(-1, latent_size, 1, 1)            # view(-1, latent_size, 1, 1)


def reference_forward(x, w_stack, b_stack, latent_size, n_layers):
    """Pure-JAX f32 reference mirroring the PyTorch forward exactly."""
    c = math.sqrt(2.0 / latent_size)
    h = x * jax.lax.rsqrt(jnp.mean(x * x, axis=1, keepdims=True) + 1e-8)
    for i in range(n_layers):
        h = h @ (w_stack[i] * c) + b_stack[i]
        if i != n_layers - 1:
            h = jnp.where(h >= 0.0, h, 0.2 * h)
    return h.reshape(-1, latent_size, 1, 1)


def reference_forward_prepared(x, w_prep, b_prep, latent_size, n_layers):
    """Pure-JAX reference with the same bf16-operand / f32-accumulate math as the kernel."""
    h = x * jax.lax.rsqrt(jnp.mean(x * x, axis=1, keepdims=True) + 1e-8)
    for i in range(n_layers):
        h = jnp.dot(h.astype(w_prep.dtype), w_prep[i],
                    preferred_element_type=jnp.float32) + b_prep[i]
        if i != n_layers - 1:
            h = jnp.maximum(h, 0.2 * h)
    return h.reshape(-1, latent_size, 1, 1)


if __name__ == "__main__":
    latent_size = 128          # lane-aligned feature axis (128)
    n_layers = 8
    batch = 12                 # exercises sublane padding (12 -> 16) and a 2-step grid

    key = jax.random.PRNGKey(0)
    kx, kw, kb = jax.random.split(key, 3)

    x = jax.random.normal(kx, (batch, latent_size), dtype=jnp.float32)

    # LinearNormalizedLR.reset_parameters: weight ~ N(0,1); biases made non-zero
    # here just to exercise the bias path. Weights stored pre-transposed (in, out)
    # so the kernel multiplies x @ W.
    w_stack = jax.random.normal(kw, (n_layers, latent_size, latent_size), dtype=jnp.float32)
    b_stack = 0.1 * jax.random.normal(kb, (n_layers, latent_size), dtype=jnp.float32)

    # One-time parameter prep (fold lr scale, cast to bf16).
    w_prep, b_prep = prepare_fnetwork_params(w_stack, b_stack, latent_size)

    y = fnetwork_forward(x, w_prep, b_prep, latent_size, n_layers)
    jax.block_until_ready(y)
    assert y.shape == (batch, latent_size, 1, 1)

    # Tight check vs. a reference using identical bf16-operand / f32-accumulate math.
    y_ref_bf16 = reference_forward_prepared(x, w_prep, b_prep, latent_size, n_layers)
    assert jnp.allclose(y, y_ref_bf16, atol=1e-2, rtol=1e-2)

    # Looser check vs. the exact f32 PyTorch semantics (bf16 MXU operands drift slightly).
    y_ref_f32 = reference_forward(x, w_stack, b_stack, latent_size, n_layers)
    assert jnp.allclose(y, y_ref_f32, atol=1e-1, rtol=1e-1)

    print("KERNEL_OK")
</pallas_src>

<mosaic_0001>
module attributes {stable_mosaic.version = 11 : i64} {
  func.func @fnetwork_kernel(%arg0: i32, %arg1: memref<8x128xf32, #tpu.memory_space<vmem>>, %arg2: memref<8x128x128xbf16, #tpu.memory_space<vmem>>, %arg3: memref<8x128xf32, #tpu.memory_space<vmem>>, %arg4: memref<8x128xf32, #tpu.memory_space<vmem>>) attributes {dimension_semantics = [#tpu.dimension_semantics<parallel>], iteration_bounds = array<i64: 2>, scalar_prefetch = 0 : i64, scratch_operands = 0 : i64, tpu.core_type = #tpu.core_type<tc>, window_params = [{transform_indices = @transform_0, window_bounds = array<i64: 8, 128>}, {pipeline_mode = #tpu.pipeline_mode<synchronous>, transform_indices = @transform_1, window_bounds = array<i64: 8, 128, 128>}, {pipeline_mode = #tpu.pipeline_mode<synchronous>, transform_indices = @transform_2, window_bounds = array<i64: 8, 128>}, {transform_indices = @transform_3, window_bounds = array<i64: 8, 128>}]} {
    %c0 = arith.constant 0 : index
    %c0_0 = arith.constant 0 : index
    %0 = vector.load %arg1[%c0, %c0_0] : memref<8x128xf32, #tpu.memory_space<vmem>>, vector<8x128xf32>
    %1 = arith.mulf %0, %0 : vector<8x128xf32>
    %cst = arith.constant dense<0.000000e+00> : vector<8xf32>
    %2 = vector.multi_reduction <add>, %1, %cst [1] : vector<8x128xf32> to vector<8xf32>
    %3 = vector.shape_cast %2 : vector<8xf32> to vector<8x1xf32>
    %cst_1 = arith.constant 1.280000e+02 : f32
    %4 = vector.broadcast %cst_1 : f32 to vector<8x1xf32>
    %5 = arith.divf %3, %4 : vector<8x1xf32>
    %cst_2 = arith.constant 9.99999993E-9 : f32
    %6 = vector.broadcast %cst_2 : f32 to vector<8x1xf32>
    %7 = arith.addf %5, %6 : vector<8x1xf32>
    %8 = math.rsqrt %7 : vector<8x1xf32>
    %9 = vector.broadcast %8 : vector<8x1xf32> to vector<8x128xf32>
    %10 = arith.mulf %0, %9 : vector<8x128xf32>
    %c0_3 = arith.constant 0 : index
    %c0_4 = arith.constant 0 : index
    %11 = vector.load %arg3[%c0_3, %c0_4] : memref<8x128xf32, #tpu.memory_space<vmem>>, vector<1x128xf32>
    %12 = arith.truncf %10 : vector<8x128xf32> to vector<8x128xbf16>
    %c0_5 = arith.constant 0 : index
    %c0_6 = arith.constant 0 : index
    %c0_7 = arith.constant 0 : index
    %13 = vector.load %arg2[%c0_5, %c0_6, %c0_7] : memref<8x128x128xbf16, #tpu.memory_space<vmem>>, vector<1x128x128xbf16>
    %14 = vector.shape_cast %13 : vector<1x128x128xbf16> to vector<128x128xbf16>
    %cst_8 = arith.constant dense<0.000000e+00> : vector<8x128xf32>
    %15 = tpu.matmul %12, %14, %cst_8 {dimension_numbers = #tpu.dot_dimension_numbers<[1], [0], [0], [1], [0, 0, 1, 1], [], []>} : vector<8x128xbf16>, vector<128x128xbf16>, vector<8x128xf32> -> vector<8x128xf32>
    %16 = vector.broadcast %11 : vector<1x128xf32> to vector<8x128xf32>
    %17 = arith.addf %15, %16 : vector<8x128xf32>
    %cst_9 = arith.constant 2.000000e-01 : f32
    %18 = vector.broadcast %cst_9 : f32 to vector<8x128xf32>
    %19 = arith.mulf %18, %17 : vector<8x128xf32>
    %20 = arith.maximumf %17, %19 : vector<8x128xf32>
    %c1 = arith.constant 1 : index
    %c0_10 = arith.constant 0 : index
    %21 = vector.load %arg3[%c1, %c0_10] : memref<8x128xf32, #tpu.memory_space<vmem>>, vector<1x128xf32>
    %22 = arith.truncf %20 : vector<8x128xf32> to vector<8x128xbf16>
    %c1_11 = arith.constant 1 : index
    %c0_12 = arith.constant 0 : index
    %c0_13 = arith.constant 0 : index
    %23 = vector.load %arg2[%c1_11, %c0_12, %c0_13] : memref<8x128x128xbf16, #tpu.memory_space<vmem>>, vector<1x128x128xbf16>
    %24 = vector.shape_cast %23 : vector<1x128x128xbf16> to vector<128x128xbf16>
    %cst_14 = arith.constant dense<0.000000e+00> : vector<8x128xf32>
    %25 = tpu.matmul %22, %24, %cst_14 {dimension_numbers = #tpu.dot_dimension_numbers<[1], [0], [0], [1], [0, 0, 1, 1], [], []>} : vector<8x128xbf16>, vector<128x128xbf16>, vector<8x128xf32> -> vector<8x128xf32>
    %26 = vector.broadcast %21 : vector<1x128xf32> to vector<8x128xf32>
    %27 = arith.addf %25, %26 : vector<8x128xf32>
    %cst_15 = arith.constant 2.000000e-01 : f32
    %28 = vector.broadcast %cst_15 : f32 to vector<8x128xf32>
    %29 = arith.mulf %28, %27 : vector<8x128xf32>
    %30 = arith.maximumf %27, %29 : vector<8x128xf32>
    %c2 = arith.constant 2 : index
    %c0_16 = arith.constant 0 : index
    %31 = vector.load %arg3[%c2, %c0_16] : memref<8x128xf32, #tpu.memory_space<vmem>>, vector<1x128xf32>
    %32 = arith.truncf %30 : vector<8x128xf32> to vector<8x128xbf16>
    %c2_17 = arith.constant 2 : index
    %c0_18 = arith.constant 0 : index
    %c0_19 = arith.constant 0 : index
    %33 = vector.load %arg2[%c2_17, %c0_18, %c0_19] : memref<8x128x128xbf16, #tpu.memory_space<vmem>>, vector<1x128x128xbf16>
    %34 = vector.shape_cast %33 : vector<1x128x128xbf16> to vector<128x128xbf16>
    %cst_20 = arith.constant dense<0.000000e+00> : vector<8x128xf32>
    %35 = tpu.matmul %32, %34, %cst_20 {dimension_numbers = #tpu.dot_dimension_numbers<[1], [0], [0], [1], [0, 0, 1, 1], [], []>} : vector<8x128xbf16>, vector<128x128xbf16>, vector<8x128xf32> -> vector<8x128xf32>
    %36 = vector.broadcast %31 : vector<1x128xf32> to vector<8x128xf32>
    %37 = arith.addf %35, %36 : vector<8x128xf32>
    %cst_21 = arith.constant 2.000000e-01 : f32
    %38 = vector.broadcast %cst_21 : f32 to vector<8x128xf32>
    %39 = arith.mulf %38, %37 : vector<8x128xf32>
    %40 = arith.maximumf %37, %39 : vector<8x128xf32>
    %c3 = arith.constant 3 : index
    %c0_22 = arith.constant 0 : index
    %41 = vector.load %arg3[%c3, %c0_22] : memref<8x128xf32, #tpu.memory_space<vmem>>, vector<1x128xf32>
    %42 = arith.truncf %40 : vector<8x128xf32> to vector<8x128xbf16>
    %c3_23 = arith.constant 3 : index
    %c0_24 = arith.constant 0 : index
    %c0_25 = arith.constant 0 : index
    %43 = vector.load %arg2[%c3_23, %c0_24, %c0_25] : memref<8x128x128xbf16, #tpu.memory_space<vmem>>, vector<1x128x128xbf16>
    %44 = vector.shape_cast %43 : vector<1x128x128xbf16> to vector<128x128xbf16>
    %cst_26 = arith.constant dense<0.000000e+00> : vector<8x128xf32>
    %45 = tpu.matmul %42, %44, %cst_26 {dimension_numbers = #tpu.dot_dimension_numbers<[1], [0], [0], [1], [0, 0, 1, 1], [], []>} : vector<8x128xbf16>, vector<128x128xbf16>, vector<8x128xf32> -> vector<8x128xf32>
    %46 = vector.broadcast %41 : vector<1x128xf32> to vector<8x128xf32>
    %47 = arith.addf %45, %46 : vector<8x128xf32>
    %cst_27 = arith.constant 2.000000e-01 : f32
    %48 = vector.broadcast %cst_27 : f32 to vector<8x128xf32>
    %49 = arith.mulf %48, %47 : vector<8x128xf32>
    %50 = arith.maximumf %47, %49 : vector<8x128xf32>
    %c4 = arith.constant 4 : index
    %c0_28 = arith.constant 0 : index
    %51 = vector.load %arg3[%c4, %c0_28] : memref<8x128xf32, #tpu.memory_space<vmem>>, vector<1x128xf32>
    %52 = arith.truncf %50 : vector<8x128xf32> to vector<8x128xbf16>
    %c4_29 = arith.constant 4 : index
    %c0_30 = arith.constant 0 : index
    %c0_31 = arith.constant 0 : index
    %53 = vector.load %arg2[%c4_29, %c0_30, %c0_31] : memref<8x128x128xbf16, #tpu.memory_space<vmem>>, vector<1x128x128xbf16>
    %54 = vector.shape_cast %53 : vector<1x128x128xbf16> to vector<128x128xbf16>
    %cst_32 = arith.constant dense<0.000000e+00> : vector<8x128xf32>
    %55 = tpu.matmul %52, %54, %cst_32 {dimension_numbers = #tpu.dot_dimension_numbers<[1], [0], [0], [1], [0, 0, 1, 1], [], []>} : vector<8x128xbf16>, vector<128x128xbf16>, vector<8x128xf32> -> vector<8x128xf32>
    %56 = vector.broadcast %51 : vector<1x128xf32> to vector<8x128xf32>
    %57 = arith.addf %55, %56 : vector<8x128xf32>
    %cst_33 = arith.constant 2.000000e-01 : f32
    %58 = vector.broadcast %cst_33 : f32 to vector<8x128xf32>
    %59 = arith.mulf %58, %57 : vector<8x128xf32>
    %60 = arith.maximumf %57, %59 : vector<8x128xf32>
    %c5 = arith.constant 5 : index
    %c0_34 = arith.constant 0 : index
    %61 = vector.load %arg3[%c5, %c0_34] : memref<8x128xf32, #tpu.memory_space<vmem>>, vector<1x128xf32>
    %62 = arith.truncf %60 : vector<8x128xf32> to vector<8x128xbf16>
    %c5_35 = arith.constant 5 : index
    %c0_36 = arith.constant 0 : index
    %c0_37 = arith.constant 0 : index
    %63 = vector.load %arg2[%c5_35, %c0_36, %c0_37] : memref<8x128x128xbf16, #tpu.memory_space<vmem>>, vector<1x128x128xbf16>
    %64 = vector.shape_cast %63 : vector<1x128x128xbf16> to vector<128x128xbf16>
    %cst_38 = arith.constant dense<0.000000e+00> : vector<8x128xf32>
    %65 = tpu.matmul %62, %64, %cst_38 {dimension_numbers = #tpu.dot_dimension_numbers<[1], [0], [0], [1], [0, 0, 1, 1], [], []>} : vector<8x128xbf16>, vector<128x128xbf16>, vector<8x128xf32> -> vector<8x128xf32>
    %66 = vector.broadcast %61 : vector<1x128xf32> to vector<8x128xf32>
    %67 = arith.addf %65, %66 : vector<8x128xf32>
    %cst_39 = arith.constant 2.000000e-01 : f32
    %68 = vector.broadcast %cst_39 : f32 to vector<8x128xf32>
    %69 = arith.mulf %68, %67 : vector<8x128xf32>
    %70 = arith.maximumf %67, %69 : vector<8x128xf32>
    %c6 = arith.constant 6 : index
    %c0_40 = arith.constant 0 : index
    %71 = vector.load %arg3[%c6, %c0_40] : memref<8x128xf32, #tpu.memory_space<vmem>>, vector<1x128xf32>
    %72 = arith.truncf %70 : vector<8x128xf32> to vector<8x128xbf16>
    %c6_41 = arith.constant 6 : index
    %c0_42 = arith.constant 0 : index
    %c0_43 = arith.constant 0 : index
    %73 = vector.load %arg2[%c6_41, %c0_42, %c0_43] : memref<8x128x128xbf16, #tpu.memory_space<vmem>>, vector<1x128x128xbf16>
    %74 = vector.shape_cast %73 : vector<1x128x128xbf16> to vector<128x128xbf16>
    %cst_44 = arith.constant dense<0.000000e+00> : vector<8x128xf32>
    %75 = tpu.matmul %72, %74, %cst_44 {dimension_numbers = #tpu.dot_dimension_numbers<[1], [0], [0], [1], [0, 0, 1, 1], [], []>} : vector<8x128xbf16>, vector<128x128xbf16>, vector<8x128xf32> -> vector<8x128xf32>
    %76 = vector.broadcast %71 : vector<1x128xf32> to vector<8x128xf32>
    %77 = arith.addf %75, %76 : vector<8x128xf32>
    %cst_45 = arith.constant 2.000000e-01 : f32
    %78 = vector.broadcast %cst_45 : f32 to vector<8x128xf32>
    %79 = arith.mulf %78, %77 : vector<8x128xf32>
    %80 = arith.maximumf %77, %79 : vector<8x128xf32>
    %c7 = arith.constant 7 : index
    %c0_46 = arith.constant 0 : index
    %81 = vector.load %arg3[%c7, %c0_46] : memref<8x128xf32, #tpu.memory_space<vmem>>, vector<1x128xf32>
    %82 = arith.truncf %80 : vector<8x128xf32> to vector<8x128xbf16>
    %c7_47 = arith.constant 7 : index
    %c0_48 = arith.constant 0 : index
    %c0_49 = arith.constant 0 : index
    %83 = vector.load %arg2[%c7_47, %c0_48, %c0_49] : memref<8x128x128xbf16, #tpu.memory_space<vmem>>, vector<1x128x128xbf16>
    %84 = vector.shape_cast %83 : vector<1x128x128xbf16> to vector<128x128xbf16>
    %cst_50 = arith.constant dense<0.000000e+00> : vector<8x128xf32>
    %85 = tpu.matmul %82, %84, %cst_50 {dimension_numbers = #tpu.dot_dimension_numbers<[1], [0], [0], [1], [0, 0, 1, 1], [], []>} : vector<8x128xbf16>, vector<128x128xbf16>, vector<8x128xf32> -> vector<8x128xf32>
    %86 = vector.broadcast %81 : vector<1x128xf32> to vector<8x128xf32>
    %87 = arith.addf %85, %86 : vector<8x128xf32>
    %c0_51 = arith.constant 0 : index
    %c0_52 = arith.constant 0 : index
    %88 = vector.load %arg4[%c0_51, %c0_52] : memref<8x128xf32, #tpu.memory_space<vmem>>, vector<8x128xf32>
    tpu.vector_store %arg4[%c0_51, %c0_52], %87 {strides = array<i32>} : memref<8x128xf32, #tpu.memory_space<vmem>>, vector<8x128xf32>,
    return
  }
  func.func @transform_0(%arg0: i32) -> (i32, i32) {
    %c0_i32 = arith.constant 0 : i32
    %c0_i32_0 = arith.constant 0 : i32
    return %arg0, %c0_i32 : i32, i32
  }
  func.func @transform_1(%arg0: i32) -> (i32, i32, i32) {
    %c0_i32 = arith.constant 0 : i32
    %c0_i32_0 = arith.constant 0 : i32
    %c0_i32_1 = arith.constant 0 : i32
    %c0_i32_2 = arith.constant 0 : i32
    return %c0_i32, %c0_i32_0, %c0_i32_1 : i32, i32, i32
  }
  func.func @transform_2(%arg0: i32) -> (i32, i32) {
    %c0_i32 = arith.constant 0 : i32
    %c0_i32_0 = arith.constant 0 : i32
    %c0_i32_1 = arith.constant 0 : i32
    return %c0_i32, %c0_i32_0 : i32, i32
  }
  func.func @transform_3(%arg0: i32) -> (i32, i32) {
    %c0_i32 = arith.constant 0 : i32
    %c0_i32_0 = arith.constant 0 : i32
    return %arg0, %c0_i32 : i32, i32
  }
}

</mosaic_0001>

<bundles_post_ra>
// kernel: tpu_custom_call.1
= control target key start
LH: loop header
LB: loop body
LE: loop exit
PB: predicated region body
PF: predicated region fallthrough
CT: control target
= control target key end

     0   :  { %8 = vsyncpa [#allocation3], 0  ;;  %s2184_s0 = inlined_call_operand.hbm [shape: f32[16,128], index: 0, kind: input, shape index: {}]   ;;  %s2185_s1 = inlined_call_operand.hbm [shape: bf16[8,128,128], index: 1, kind: input, shape index: {}]   ;;  %s2186_s2 = inlined_call_operand.hbm [shape: f32[8,128], index: 2, kind: input, shape index: {}]   ;;  %s2187_s3 = inlined_call_operand.hbm [shape: f32[16,128], index: 3, kind: output, shape index: {}]  }
   0x1   :  { %10 = vsyncpa [#allocation3 + $0x1], 0 }
   0x2   :  { %11 = vsyncpa [#allocation6], 0 }
   0x3   :  { %12 = vsyncpa [#allocation4], 0 }
   0x4   :  { %14 = vsyncpa [#allocation4 + $0x1], 0  ;;  %s1871_s12 = smov 0   ;;  %s1873_s13 = smov 0  }
   0x5   :  { %s1875_s14 = smov 0   ;;  %s1877_s15 = smov 0  }
   0x6 LB: > { %s1892_s16 = sadd.s32 4294967295, %s1841_s15   ;;  %s1228_s17 = sadd.s32 4294967294, %s1841_s15   ;;  %s1841_s15 = sphi %s1877_s15, %s2207_s15   ;;  %s1837_s14 = sphi %s1875_s14, %s2206_s14   ;;  %s1833_s13 = sphi %s1873_s13, %s2205_s13   ;;  %s1829_s12 = sphi %s1871_s12, %s2204_s12  }
   0x7   : > { %p40_p0 = scmp.ne.s32.totalorder %s1833_s13, %s1829_s12  ;;  %p2188_p1 = scmp.eq.s32.totalorder %s1892_s16, 0 }
   0x8   : > { %p112_p3 = scmp.eq.s32.totalorder %s1228_s17, 1  ;;  %p1229_p5 = scmp.ge.s32.totalorder %s1841_s15, 1 }
   0x9   : > { %p1901_p4 = por %p2188_p1, %p40_p0  ;;  %p119_p7 = scmp.lt.s32.totalorder %s1841_s15, 3 }
   0xa   : > { %p1906_p6 = por %p112_p3, %p40_p0  ;;  %s1843_s21 = smov [#allocation5]  }
   0xb   : > { %s2191_s18 = scalar_select %p1901_p4, 1, 0 }
   0xc   : > { %s2192_s19 = scalar_select %p1906_p6, 1, 0 }
   0xd   : > { %p1911_p8 = pnand %p1229_p5, %p119_p7  ;;  %s131_s22 = sshll.u32 %s1843_s21, 4  ;;  %s1915_s22 = int_to_ptr.vmem [resolvable:$true] %s131_s22 }
   0xe   : > { %s1844_s24 = smov [#allocation7]   ;;  %s1685_s28 = scalar_lea.hbm %s2185_s1, 8192 }
   0xf   : > { %p1560_p9 = pneg %p1911_p8  ;;  %s145_s25 = sshll.u32 %s1844_s24, 4  ;;  %s1926_s25 = int_to_ptr.vmem [resolvable:$true] %s145_s25 }
  0x10   : > { %p1686_p12 = scmp.ne.s32.totalorder %s2185_s1, %s1685_s28  ;;  %p1692_p5 = scmp.lt.u32.totalorder %s1685_s28, %s2185_s1 }
  0x11   : > { %p1922_p11 = pnand %p1560_p9, %p2188_p1 }
  0x13   : > { %p1687_p13 = pneg %p1922_p11 }
  0x15   : > { %p1688_p0 = pnand %p1687_p13, %p1686_p12 }
  0x17   : > { %p1689_p3 = pneg %p1688_p0 }
  0x19   : > { %p1694_p7 = pnand %p1692_p5, %p1689_p3 }
  0x1b   : > { %1697 = shalt.err (!%p1694_p7)
}
  0x1c   : > { %s1698_s6 = scalar_lea.vmem %s1915_s22, 8192  ;;  %p1706_p2 = scmp.lt.s32.totalorder %s1915_s22, %s1915_s22 }
  0x1d   : > { %p1699_p9 = scmp.ne.s32.totalorder %s1915_s22, %s1698_s6  ;;  %p1707_p12 = scmp.lt.s32.totalorder %s1698_s6, %s1698_s6 }
  0x1f   : > { %p1701_p10 = pnand %p1699_p9, %p1687_p13  ;;  %p1708_p0 = por %p1707_p12, %p1706_p2 }
  0x21   : > { %p1702_p1 = pneg %p1701_p10 }
  0x23   : > { %p1709_p6 = pnand %p1708_p0, %p1702_p1 }
  0x25   : > { %1712 = shalt.err (!%p1709_p6)
}
  0x26   : > { %s1845_s7 = smov 64   ;;  %s1846_s8 = smov 4  }
  0x27   : > { %1563 = dma.hbm_to_vmem [thread:$0]  (!%p1922_p11), %s2185_s1, 8192, %s1915_s22, [#allocation6], %s1845_s7, %s1845_s7, %s1846_s8  }
  0x28   : > { %s1713_s21 = scalar_lea.hbm %s2186_s2, 128 }
  0x29   : > { %p1714_p2 = scmp.ne.s32.totalorder %s2186_s2, %s1713_s21  ;;  %p1720_p10 = scmp.lt.u32.totalorder %s1713_s21, %s2186_s2 }
  0x2b   : > { %p1716_p1 = pnand %p1714_p2, %p1687_p13 }
  0x2d   : > { %p1717_p6 = pneg %p1716_p1 }
  0x2f   : > { %p1722_p3 = pnand %p1720_p10, %p1717_p6 }
  0x31   : > { %1725 = shalt.err (!%p1722_p3)
}
  0x32   : > { %s1726_s22 = scalar_lea.vmem %s1926_s25, 128  ;;  %p1734_p12 = scmp.lt.s32.totalorder %s1926_s25, %s1926_s25 }
  0x33   : > { %p1727_p5 = scmp.ne.s32.totalorder %s1926_s25, %s1726_s22  ;;  %p1735_p0 = scmp.lt.s32.totalorder %s1726_s22, %s1726_s22 }
  0x35   : > { %p1729_p7 = pnand %p1727_p5, %p1687_p13  ;;  %p1736_p2 = por %p1735_p0, %p1734_p12 }
  0x37   : > { %p1730_p9 = pneg %p1729_p7 }
  0x39   : > { %p1737_p1 = pnand %p1736_p2, %p1730_p9 }
  0x3b   : > { %1740 = shalt.err (!%p1737_p1)
}
  0x3c   : > { %1566 = dma.hbm_to_vmem [thread:$0]  (!%p1922_p11), %s2186_s2, 128, %s1926_s25, [#allocation6]  }
  0x3d   : > { %s1981_s4 = sadd.s32 1, %s1841_s15   ;;  %s27_s23 = sadd.s32 1, %s1837_s14 }
  0x3e   : > { %s24_s5 = ssub.s32 %s1841_s15, %s1981_s4  ;;  %p34_p13 = scmp.ne.s32.totalorder %s1837_s14, %s1833_s13 }
  0x3f   : > { %p25_p6 = scmp.eq.s32.totalorder %s24_s5, 0  ;;  %p35_p10 = scmp.eq.s32.totalorder %s1841_s15, 0 }
  0x40   : > { %p2195_p3 = scmp.eq.s32.totalorder %s1892_s16, 1  ;;  %p1577_p7 = scmp.lt.s32.totalorder %s1841_s15, 2 }
  0x41   : > { %s1997_s7 = scalar_select %p25_p6, %s1837_s14, %s27_s23  }
  0x42   : > { %p1991_p5 = por %p2195_p3, %p34_p13  ;;  %p36_p9 = por %p35_p10, %p34_p13 }
  0x43   : > { %s156_s8 = sand.u32 1, %s1837_s14   ;;  %s1234_s25 = sshll.u32 %s1841_s15, 7 }
  0x44   : > { %s2196_s6 = scalar_select %p1991_p5, 1, 0 }
  0x45   : > { %s1233_s9 = sshll.u32 %s156_s8, 3  ;;  %s2004_s17 = scalar_lea.hbm %s2184_s0, %s1234_s25 }
  0x46   : > { %s160_s21 = scalar_lea.vmem [#allocation2], %s1233_s9  ;;  %p2008_p11 = pnand %p1577_p7, %p36_p9 }
  0x47   : > { %s167_s24 = sshll.u32 %s160_s21, 4  ;;  %s157_s27 = scalar_lea.sflag [#allocation3], %s156_s8  ;;  %s2006_s24 = int_to_ptr.vmem [resolvable:$true] %s167_s24 }
  0x48   : > { %s1741_s28 = scalar_lea.hbm %s2004_s17, 128  ;;  %p1743_p0 = pneg %p2008_p11 }
  0x49   : > { %p1742_p12 = scmp.ne.s32.totalorder %s2004_s17, %s1741_s28  ;;  %s1746_s30 = scalar_lea.hbm %s2184_s0, 256 }
  0x4a   : > { %p1747_p13 = scmp.lt.u32.totalorder %s2004_s17, %s2184_s0  ;;  %p1748_p6 = scmp.lt.u32.totalorder %s1746_s30, %s1741_s28 }
  0x4b   : > { %p1744_p2 = pnand %p1743_p0, %p1742_p12  ;;  %p1750_p3 = scmp.lt.u32.totalorder %s1741_s28, %s2004_s17 }
  0x4c   : > { %p1749_p10 = por %p1748_p6, %p1747_p13 }
  0x4d   : > { %p1745_p1 = pneg %p1744_p2 }
  0x4e   : > { %p1751_p7 = por %p1750_p3, %p1749_p10 }
  0x50   : > { %p1752_p9 = pnand %p1751_p7, %p1745_p1 }
  0x52   : > { %1755 = shalt.err (!%p1752_p9)
}
  0x53   : > { %s1756_s8 = scalar_lea.vmem %s2006_s24, 128  ;;  %s1847_s9 = smov [#allocation2]  }
  0x54   : > { %p1757_p12 = scmp.ne.s32.totalorder %s2006_s24, %s1756_s8  ;;  %s1761_s25 = sshll.u32 %s1847_s9, 4  ;;  %s1762_s25 = int_to_ptr.vmem [resolvable:$false] %s1761_s25 }
  0x55   : > { %s1763_s10 = scalar_lea.vmem %s1762_s25, 256  ;;  %p1764_p4 = scmp.lt.s32.totalorder %s2006_s24, %s1762_s25 }
  0x56   : > { %p1759_p2 = pnand %p1757_p12, %p1743_p0  ;;  %p1765_p13 = scmp.lt.s32.totalorder %s1763_s10, %s1756_s8 }
  0x58   : > { %p1760_p5 = pneg %p1759_p2  ;;  %p1766_p6 = por %p1765_p13, %p1764_p4 }
  0x5a   : > { %p1767_p10 = pnand %p1766_p6, %p1760_p5 }
  0x5c   : > { %1770 = shalt.err (!%p1767_p10)
}
  0x5d   : > { %1570 = dma.hbm_to_vmem [thread:$0]  (!%p2008_p11), %s2004_s17, 128, %s2006_s24, %s157_s27  }
  0x5e   : > { %176 = sbr.rel (%p1911_p8) target bundleno = 2037 (0x7f5), region = 32  ;;  %s2040_s11 = sand.u32 (!%p1911_p8), 1, %s1833_s13  }
  0x5f   : > { %s1236_s21 = sshll.u32 (!%p1911_p8), %s2040_s11, 3  ;;  %s179_s28 = scalar_lea.sflag (!%p1911_p8), [#allocation3], %s2040_s11 }
  0x60   : > { %s182_s22 = scalar_lea.vmem (!%p1911_p8), [#allocation2], %s1236_s21  ;;  %p2198_p4 = scmp.ne.s32.totalorder (!%p1911_p8), %s2191_s18, 0 }
  0x65   : > { %1816 = dma.done.wait (%p2198_p4), %s179_s28, 128  }
  0x66   : > { %1818 = vsyncadd (%p2198_p4), %s179_s28, 4294967168  ;;  %p2199_p5 = scmp.eq.s32.totalorder %s1892_s16, 0 }
  0x68   : > { %1820 = dma.done.wait (%p2199_p5), [#allocation6], 8320   ;;  %p2200_p8 = pmov %p2199_p5 }
  0x69   : > { %v1848_v0 = vmov 0.0   ;;  %v214_v1 = vld [vmem:[%s182_s22] sm:$0xff]  ;;  %v1619_v3 = vld [vmem:[#allocation5] sm:$0xff]   ;;  %v1620_v4 = vld [vmem:[#allocation5 + $0x8] sm:$0xff]   ;;  %vm1849_vm0 = vmmov 0   ;;  %s1313_s18 = sshll.u32 %s1892_s16, 7 }
  0x6a   : > { %1822 = vsyncadd (%p2200_p8), [#allocation6], 4294958976  ;;  %1388 = vmatprep.subr.bf16.mxu0 %v1848_v0  ;;  %1408 = vmatprep.subr.bf16.mxu1 %v1848_v0  ;;  %v215_v2 = vmul.f32 %v214_v1, %v214_v1  ;;  %v1621_v5 = vld [vmem:[#allocation5 + $0x10] sm:$0xff]   ;;  %v1622_v6 = vld [vmem:[#allocation5 + $0x18] sm:$0xff]   ;;  %s212_s20 = scalar_lea.vmem [#allocation8], %s1236_s21  ;;  %s2140_s27 = scalar_lea.hbm %s2187_s3, %s1313_s18 }
  0x6b   : > { %1389 = vmatpush3.bf16.msra.mxu0 %v1619_v3  ;;  %v1623_v7 = vld [vmem:[#allocation5 + $0x20] sm:$0xff]   ;;  %v1624_v8 = vld [vmem:[#allocation5 + $0x28] sm:$0xff]   ;;  %1404 = vmatprep.mubr.msk.bf16.mxu0 %vm1849_vm0, %v1848_v0  ;;  %v1625_v9 = vld [vmem:[#allocation5 + $0x30] sm:$0xff]   ;;  %s1139_s17 = sshll.u32 %s212_s20, 4  ;;  %s1126_s16 = scalar_lea.sflag [#allocation4], %s2040_s11  ;;  %s2142_s17 = int_to_ptr.vmem [resolvable:$true] %s1139_s17 }
  0x6c   : > { %216 = vadd.xlane.f32.xlu0 %v215_v2  ;;  %1390 = vmatprep.subr.bf16.mxu0 %v1848_v0  ;;  %v1626_v10 = vld [vmem:[#allocation5 + $0x38] sm:$0xff]   ;;  %v1627_v11 = vld [vmem:[#allocation5 + $0x40] sm:$0xff]   ;;  %v1628_v12 = vld [vmem:[#allocation5 + $0x48] sm:$0xff]   ;;  %s1771_s29 = scalar_lea.vmem %s2142_s17, 128  ;;  %p2201_p0 = scmp.ne.s32.totalorder %s2196_s6, 0 }
  0x6d   : > { %1424 = vmatprep.mubr.msk.bf16.mxu1 %vm1849_vm0, %v1848_v0  ;;  %1409 = vmatpush3.bf16.msra.mxu1 %v1627_v11  ;;  %v1629_v13 = vld [vmem:[#allocation5 + $0x50] sm:$0xff]   ;;  %v1630_v14 = vld [vmem:[#allocation5 + $0x58] sm:$0xff]   ;;  %v1631_v15 = vld [vmem:[#allocation5 + $0x60] sm:$0xff]   ;;  %p1772_p11 = scmp.ne.s32.totalorder %s2142_s17, %s1771_s29  ;;  %s1850_s30 = smov [#allocation8]  }
  0x6e   : > { %1410 = vmatprep.subr.bf16.mxu1 %v1848_v0  ;;  %v1632_v16 = vld [vmem:[#allocation5 + $0x68] sm:$0xff]   ;;  %v1633_v23 = vld [vmem:[#allocation5 + $0x70] sm:$0xff]   ;;  %v1634_v24 = vld [vmem:[#allocation5 + $0x78] sm:$0xff]   ;;  %s1775_s23 = sshll.u32 %s1850_s30, 4  ;;  %s1776_s23 = int_to_ptr.vmem [resolvable:$false] %s1775_s23 }
  0x6f   : > { %1391 = vmatpush3.bf16.msra.mxu0 %v1620_v4  ;;  %v1635_v25 = vld [vmem:[#allocation5 + $0x80] sm:$0xff]   ;;  %v1636_v26 = vld [vmem:[#allocation5 + $0x88] sm:$0xff]   ;;  %v1637_v27 = vld [vmem:[#allocation5 + $0x90] sm:$0xff]   ;;  %p1773_p1 = pnand %p1772_p11, %p2201_p0  ;;  %s1777_s5 = scalar_lea.vmem %s1776_s23, 256 }
  0x70   : > { %1392 = vmatprep.subr.bf16.mxu0 %v1848_v0  ;;  %v1638_v28 = vld [vmem:[#allocation5 + $0x98] sm:$0xff]   ;;  %v1639_v29 = vld [vmem:[#allocation5 + $0xa0] sm:$0xff]   ;;  %v1640_v30 = vld [vmem:[#allocation5 + $0xa8] sm:$0xff]   ;;  %p1778_p7 = scmp.lt.s32.totalorder %s2142_s17, %s1776_s23  ;;  %p1779_p9 = scmp.lt.s32.totalorder %s1777_s5, %s1771_s29 }
  0x71   : > { %1411 = vmatpush3.bf16.msra.mxu1 %v1628_v12  ;;  %v1240_v31 = vld [vmem:[#allocation7] ss:$0 sm:$0xff]  ;;  %v1641_v40 = vld [vmem:[#allocation5 + $0xb0] sm:$0xff]   ;;  %v1642_v41 = vld [vmem:[#allocation5 + $0xb8] sm:$0xff]   ;;  %p1774_p3 = pneg %p1773_p1 }
  0x72   : > { %1412 = vmatprep.subr.bf16.mxu1 %v1848_v0  ;;  %v1643_v42 = vld [vmem:[#allocation5 + $0xc0] sm:$0xff]   ;;  %v1644_v43 = vld [vmem:[#allocation5 + $0xc8] sm:$0xff]   ;;  %v1645_v44 = vld [vmem:[#allocation5 + $0xd0] sm:$0xff]   ;;  %p1780_p12 = por %p1779_p9, %p1778_p7 }
  0x73   : > { %1393 = vmatpush3.bf16.msra.mxu0 %v1621_v5  ;;  %v1646_v45 = vld [vmem:[#allocation5 + $0xd8] sm:$0xff]   ;;  %v1647_v46 = vld [vmem:[#allocation5 + $0xe0] sm:$0xff]   ;;  %v1648_v47 = vld [vmem:[#allocation5 + $0xe8] sm:$0xff]  }
  0x74   : > { %1394 = vmatprep.subr.bf16.mxu0 %v1848_v0  ;;  %v1249_v48 = vld [vmem:[#allocation7 + $0x1] ss:$0 sm:$0xff]  ;;  %v1649_v57 = vld [vmem:[#allocation5 + $0xf0] sm:$0xff]   ;;  %v1650_v58 = vld [vmem:[#allocation5 + $0xf8] sm:$0xff]   ;;  %p1781_p2 = pnand %p1780_p12, %p1774_p3 }
  0x75   : > { %1413 = vmatpush3.bf16.msra.mxu1 %v1629_v13  ;;  %v1651_v59 = vld [vmem:[#allocation5 + $0x100] sm:$0xff]   ;;  %v1652_v60 = vld [vmem:[#allocation5 + $0x108] sm:$0xff]   ;;  %v1653_v61 = vld [vmem:[#allocation5 + $0x110] sm:$0xff]  }
  0x76   : > { %1414 = vmatprep.subr.bf16.mxu1 %v1848_v0  ;;  %v1654_v62 = vld [vmem:[#allocation5 + $0x118] sm:$0xff]   ;;  %v1655_v63 = vld [vmem:[#allocation5 + $0x120] sm:$0xff]   ;;  %v1657_v11 = vld [vmem:[#allocation5 + $0x130] sm:$0xff]  }
  0x77   : > { %1395 = vmatpush3.bf16.msra.mxu0 %v1622_v6  ;;  %v1258_v2 = vld [vmem:[#allocation7 + $0x2] ss:$0 sm:$0xff]  ;;  %v1658_v12 = vld [vmem:[#allocation5 + $0x138] sm:$0xff]  }
  0x78   : > { %1396 = vmatprep.subr.bf16.mxu0 %v1848_v0  ;;  %v1659_v13 = vld [vmem:[#allocation5 + $0x140] sm:$0xff]  }
  0x79   : > { %1415 = vmatpush3.bf16.msra.mxu1 %v1630_v14  ;;  %v1660_v14 = vld [vmem:[#allocation5 + $0x148] sm:$0xff]  }
  0x7a   : > { %1416 = vmatprep.subr.bf16.mxu1 %v1848_v0 }
  0x7b   : > { %1397 = vmatpush3.bf16.msra.mxu0 %v1623_v7 }
  0x7c   : > { %1398 = vmatprep.subr.bf16.mxu0 %v1848_v0 }
  0x7d   : > { %1417 = vmatpush3.bf16.msra.mxu1 %v1631_v15  ;;  %v1661_v15 = vld [vmem:[#allocation5 + $0x150] sm:$0xff]  }
  0x7e   : > { %1418 = vmatprep.subr.bf16.mxu1 %v1848_v0 }
  0x7f   : > { %1399 = vmatpush3.bf16.msra.mxu0 %v1624_v8 }
  0x80   : > { %1400 = vmatprep.subr.bf16.mxu0 %v1848_v0 }
  0x81   : > { %1419 = vmatpush3.bf16.msra.mxu1 %v1632_v16  ;;  %v1662_v16 = vld [vmem:[#allocation5 + $0x158] sm:$0xff]  }
  0x82   : > { %1420 = vmatprep.subr.bf16.mxu1 %v1848_v0 }
  0x83   : > { %1401 = vmatpush3.bf16.msra.mxu0 %v1625_v9 }
  0x84   : > { %1402 = vmatprep.subr.bf16.mxu0 %v1848_v0 }
  0x85   : > { %1421 = vmatpush3.bf16.msra.mxu1 %v1633_v23 }
  0x86   : > { %1422 = vmatprep.subr.bf16.mxu1 %v1848_v0 }
  0x87   : > { %1403 = vmatpush3.bf16.msra.mxu0 %v1626_v10 }
  0x88   : > { %1428 = vmatprep.subr.bf16.mxu0 %v1848_v0 }
  0x89   : > { %1423 = vmatpush3.bf16.msra.mxu1 %v1634_v24 }
  0x8a   : > { %1448 = vmatprep.subr.bf16.mxu1 %v1848_v0 }
  0xf9   : > { %v217_v17 = vpop.xlane.xlu0 %216 }
  0xfa   : > { %v219_v18 = vmul.f32 0.0078125, %v217_v17  ;;  %v1663_v17 = vld [vmem:[#allocation5 + $0x160] sm:$0xff]  }
  0xfc   : > { %v220_v19 = vadd.f32 1e-08, %v219_v18  ;;  %v1664_v18 = vld [vmem:[#allocation5 + $0x168] sm:$0xff]  }
  0xfe   : > { %1683 = vrsqrt.f32 %v220_v19  ;;  %v1267_v19 = vld [vmem:[#allocation7 + $0x3] ss:$0 sm:$0xff] }
 0x108   : > { %v1684_v20 = vpop.eup %1683 }
 0x109   : > { %v222_v21 = vmul.f32 %v1684_v20, %v214_v1  ;;  %v1656_v1 = vld [vmem:[#allocation5 + $0x128] sm:$0xff]  }
 0x10b   : > { %v224_v22 = vpack.c.bf16 %v222_v21, %v222_v21 }
 0x10d   : > { %1405 = vmatmul.mubr.bf16.vlgmr.msra.gmra.mrb[0].mxu0 %v224_v22 }
 0x10e   : > { %1444 = vmatprep.mubr.msk.bf16.mxu0 %vm1849_vm0, %v1848_v0  ;;  %1429 = vmatpush3.bf16.msra.mxu0 %v1635_v25 }
 0x10f   : > { %1430 = vmatprep.subr.bf16.mxu0 %v1848_v0 }
 0x112   : > { %1431 = vmatpush3.bf16.msra.mxu0 %v1636_v26 }
 0x113   : > { %1432 = vmatprep.subr.bf16.mxu0 %v1848_v0 }
 0x116   : > { %1433 = vmatpush3.bf16.msra.mxu0 %v1637_v27 }
 0x117   : > { %1434 = vmatprep.subr.bf16.mxu0 %v1848_v0 }
 0x11a   : > { %1435 = vmatpush3.bf16.msra.mxu0 %v1638_v28  ;;  %v1665_v28 = vld [vmem:[#allocation5 + $0x170] sm:$0xff]  }
 0x11b   : > { %1436 = vmatprep.subr.bf16.mxu0 %v1848_v0 }
 0x11e   : > { %1437 = vmatpush3.bf16.msra.mxu0 %v1639_v29  ;;  %v1666_v29 = vld [vmem:[#allocation5 + $0x178] sm:$0xff]  }
 0x11f   : > { %1438 = vmatprep.subr.bf16.mxu0 %v1848_v0 }
 0x122   : > { %1439 = vmatpush3.bf16.msra.mxu0 %v1640_v30  ;;  %v1667_v30 = vld [vmem:[#allocation5 + $0x180] sm:$0xff]  }
 0x123   : > { %1440 = vmatprep.subr.bf16.mxu0 %v1848_v0 }
 0x126   : > { %1441 = vmatpush3.bf16.msra.mxu0 %v1641_v40 }
 0x127   : > { %1442 = vmatprep.subr.bf16.mxu0 %v1848_v0 }
 0x12a   : > { %1443 = vmatpush3.bf16.msra.mxu0 %v1642_v41 }
 0x12b   : > { %1468 = vmatprep.subr.bf16.mxu0 %v1848_v0 }
 0x1e0   : > { %v327_v32 = vpop.f32.mrb[0].mxu0 }
 0x1e1   : > { %v328_v33 = vadd.f32 %v1240_v31, %v327_v32  ;;  %v1406_v34 = vpop.f32.mrb[1].mxu0  ;;  %v1668_v31 = vld [vmem:[#allocation5 + $0x188] sm:$0xff]   ;;  %v1669_v32 = vld [vmem:[#allocation5 + $0x190] sm:$0xff]  }
 0x1e2   : > { %v330_v35 = vpop.f32.mrb[2].mxu0  ;;  %v1671_v34 = vld [vmem:[#allocation5 + $0x1a0] sm:$0xff]  }
 0x1e3   : > { %v333_v36 = vmul.f32 0.2, %v328_v33  ;;  %v1407_v37 = vpop.f32.mrb[3].mxu0  ;;  %v1672_v35 = vld [vmem:[#allocation5 + $0x1a8] sm:$0xff]  }
 0x1e5   : > { %v334_v38 = vmax.f32 %v328_v33, %v333_v36  ;;  %v1670_v33 = vld [vmem:[#allocation5 + $0x198] sm:$0xff]   ;;  %v1276_v36 = vld [vmem:[#allocation7 + $0x4] ss:$0 sm:$0xff] }
 0x1e7   : > { %v336_v39 = vpack.c.bf16 %v334_v38, %v334_v38 }
 0x1e9   : > { %1425 = vmatmul.mubr.bf16.vlgmr.msra.gmra.mrb[0].mxu1 %v336_v39 }
 0x1ea   : > { %1464 = vmatprep.mubr.msk.bf16.mxu1 %vm1849_vm0, %v1848_v0  ;;  %1449 = vmatpush3.bf16.msra.mxu1 %v1643_v42 }
 0x1eb   : > { %1450 = vmatprep.subr.bf16.mxu1 %v1848_v0 }
 0x1ee   : > { %1451 = vmatpush3.bf16.msra.mxu1 %v1644_v43 }
 0x1ef   : > { %1452 = vmatprep.subr.bf16.mxu1 %v1848_v0 }
 0x1f2   : > { %1453 = vmatpush3.bf16.msra.mxu1 %v1645_v44 }
 0x1f3   : > { %1454 = vmatprep.subr.bf16.mxu1 %v1848_v0 }
 0x1f6   : > { %1455 = vmatpush3.bf16.msra.mxu1 %v1646_v45  ;;  %v1673_v45 = vld [vmem:[#allocation5 + $0x1b0] sm:$0xff]  }
 0x1f7   : > { %1456 = vmatprep.subr.bf16.mxu1 %v1848_v0 }
 0x1fa   : > { %1457 = vmatpush3.bf16.msra.mxu1 %v1647_v46  ;;  %v1674_v46 = vld [vmem:[#allocation5 + $0x1b8] sm:$0xff]  }
 0x1fb   : > { %1458 = vmatprep.subr.bf16.mxu1 %v1848_v0 }
 0x1fe   : > { %1459 = vmatpush3.bf16.msra.mxu1 %v1648_v47  ;;  %v1675_v47 = vld [vmem:[#allocation5 + $0x1c0] sm:$0xff]  }
 0x1ff   : > { %1460 = vmatprep.subr.bf16.mxu1 %v1848_v0 }
 0x202   : > { %1461 = vmatpush3.bf16.msra.mxu1 %v1649_v57 }
 0x203   : > { %1462 = vmatprep.subr.bf16.mxu1 %v1848_v0 }
 0x206   : > { %1463 = vmatpush3.bf16.msra.mxu1 %v1650_v58 }
 0x207   : > { %1488 = vmatprep.subr.bf16.mxu1 %v1848_v0 }
 0x2bc   : > { %v440_v49 = vpop.f32.mrb[0].mxu1 }
 0x2bd   : > { %v441_v50 = vadd.f32 %v1249_v48, %v440_v49  ;;  %v1426_v51 = vpop.f32.mrb[1].mxu1  ;;  %v1676_v48 = vld [vmem:[#allocation5 + $0x1c8] sm:$0xff]   ;;  %v1677_v49 = vld [vmem:[#allocation5 + $0x1d0] sm:$0xff]  }
 0x2be   : > { %v443_v52 = vpop.f32.mrb[2].mxu1  ;;  %v1679_v51 = vld [vmem:[#allocation5 + $0x1e0] sm:$0xff]  }
 0x2bf   : > { %v446_v53 = vmul.f32 0.2, %v441_v50  ;;  %v1427_v54 = vpop.f32.mrb[3].mxu1  ;;  %v1680_v52 = vld [vmem:[#allocation5 + $0x1e8] sm:$0xff]  }
 0x2c1   : > { %v447_v55 = vmax.f32 %v441_v50, %v446_v53  ;;  %v1678_v50 = vld [vmem:[#allocation5 + $0x1d8] sm:$0xff]   ;;  %v1285_v53 = vld [vmem:[#allocation7 + $0x5] ss:$0 sm:$0xff] }
 0x2c3   : > { %v449_v56 = vpack.c.bf16 %v447_v55, %v447_v55 }
 0x2c5   : > { %1445 = vmatmul.mubr.bf16.vlgmr.msra.gmra.mrb[4].mxu0 %v449_v56 }
 0x2c6   : > { %1484 = vmatprep.mubr.msk.bf16.mxu0 %vm1849_vm0, %v1848_v0  ;;  %1469 = vmatpush3.bf16.msra.mxu0 %v1651_v59 }
 0x2c7   : > { %1470 = vmatprep.subr.bf16.mxu0 %v1848_v0 }
 0x2ca   : > { %1471 = vmatpush3.bf16.msra.mxu0 %v1652_v60 }
 0x2cb   : > { %1472 = vmatprep.subr.bf16.mxu0 %v1848_v0 }
 0x2ce   : > { %1473 = vmatpush3.bf16.msra.mxu0 %v1653_v61 }
 0x2cf   : > { %1474 = vmatprep.subr.bf16.mxu0 %v1848_v0 }
 0x2d2   : > { %1475 = vmatpush3.bf16.msra.mxu0 %v1654_v62  ;;  %v1681_v62 = vld [vmem:[#allocation5 + $0x1f0] sm:$0xff]  }
 0x2d3   : > { %1476 = vmatprep.subr.bf16.mxu0 %v1848_v0 }
 0x2d6   : > { %1477 = vmatpush3.bf16.msra.mxu0 %v1655_v63  ;;  %v1682_v63 = vld [vmem:[#allocation5 + $0x1f8] sm:$0xff]  }
 0x2d7   : > { %1478 = vmatprep.subr.bf16.mxu0 %v1848_v0 }
 0x2da   : > { %1479 = vmatpush3.bf16.msra.mxu0 %v1656_v1  ;;  %v1294_v1 = vld [vmem:[#allocation7 + $0x6] ss:$0 sm:$0xff] }
 0x2db   : > { %1480 = vmatprep.subr.bf16.mxu0 %v1848_v0 }
 0x2de   : > { %1481 = vmatpush3.bf16.msra.mxu0 %v1657_v11 }
 0x2df   : > { %1482 = vmatprep.subr.bf16.mxu0 %v1848_v0 }
 0x2e2   : > { %1483 = vmatpush3.bf16.msra.mxu0 %v1658_v12 }
 0x2e3   : > { %1508 = vmatprep.subr.bf16.mxu0 %v1848_v0 }
 0x398   : > { %v553_v3 = vpop.f32.mrb[4].mxu0 }
 0x399   : > { %v554_v4 = vadd.f32 %v1258_v2, %v553_v3  ;;  %v1446_v5 = vpop.f32.mrb[5].mxu0 }
 0x39a   : > { %v556_v6 = vpop.f32.mrb[6].mxu0 }
 0x39b   : > { %v559_v7 = vmul.f32 0.2, %v554_v4  ;;  %v1447_v8 = vpop.f32.mrb[7].mxu0 }
 0x39d   : > { %v560_v9 = vmax.f32 %v554_v4, %v559_v7 }
 0x39f   : > { %v562_v10 = vpack.c.bf16 %v560_v9, %v560_v9 }
 0x3a1   : > { %1465 = vmatmul.mubr.bf16.vlgmr.msra.gmra.mrb[4].mxu1 %v562_v10  ;;  %v1303_v10 = vld [vmem:[#allocation7 + $0x7] ss:$0 sm:$0xff] }
 0x3a2   : > { %1504 = vmatprep.mubr.msk.bf16.mxu1 %vm1849_vm0, %v1848_v0  ;;  %1489 = vmatpush3.bf16.msra.mxu1 %v1659_v13 }
 0x3a3   : > { %1490 = vmatprep.subr.bf16.mxu1 %v1848_v0 }
 0x3a6   : > { %1491 = vmatpush3.bf16.msra.mxu1 %v1660_v14 }
 0x3a7   : > { %1492 = vmatprep.subr.bf16.mxu1 %v1848_v0 }
 0x3aa   : > { %1493 = vmatpush3.bf16.msra.mxu1 %v1661_v15 }
 0x3ab   : > { %1494 = vmatprep.subr.bf16.mxu1 %v1848_v0 }
 0x3ae   : > { %1495 = vmatpush3.bf16.msra.mxu1 %v1662_v16 }
 0x3af   : > { %1496 = vmatprep.subr.bf16.mxu1 %v1848_v0 }
 0x3b2   : > { %1497 = vmatpush3.bf16.msra.mxu1 %v1663_v17 }
 0x3b3   : > { %1498 = vmatprep.subr.bf16.mxu1 %v1848_v0 }
 0x3b6   : > { %1499 = vmatpush3.bf16.msra.mxu1 %v1664_v18 }
 0x3b7   : > { %1500 = vmatprep.subr.bf16.mxu1 %v1848_v0 }
 0x3ba   : > { %1501 = vmatpush3.bf16.msra.mxu1 %v1665_v28 }
 0x3bb   : > { %1502 = vmatprep.subr.bf16.mxu1 %v1848_v0 }
 0x3be   : > { %1503 = vmatpush3.bf16.msra.mxu1 %v1666_v29 }
 0x3bf   : > { %1528 = vmatprep.subr.bf16.mxu1 %v1848_v0 }
 0x474   : > { %v666_v20 = vpop.f32.mrb[4].mxu1 }
 0x475   : > { %v667_v21 = vadd.f32 %v1267_v19, %v666_v20  ;;  %v1466_v22 = vpop.f32.mrb[5].mxu1 }
 0x476   : > { %v669_v23 = vpop.f32.mrb[6].mxu1 }
 0x477   : > { %v672_v24 = vmul.f32 0.2, %v667_v21  ;;  %v1467_v25 = vpop.f32.mrb[7].mxu1 }
 0x479   : > { %v673_v26 = vmax.f32 %v667_v21, %v672_v24 }
 0x47b   : > { %v675_v27 = vpack.c.bf16 %v673_v26, %v673_v26 }
 0x47d   : > { %1485 = vmatmul.mubr.bf16.vlgmr.msra.gmra.mrb[8].mxu0 %v675_v27 }
 0x47e   : > { %1524 = vmatprep.mubr.msk.bf16.mxu0 %vm1849_vm0, %v1848_v0  ;;  %1509 = vmatpush3.bf16.msra.mxu0 %v1667_v30 }
 0x47f   : > { %1510 = vmatprep.subr.bf16.mxu0 %v1848_v0 }
 0x482   : > { %1511 = vmatpush3.bf16.msra.mxu0 %v1668_v31 }
 0x483   : > { %1512 = vmatprep.subr.bf16.mxu0 %v1848_v0 }
 0x486   : > { %1513 = vmatpush3.bf16.msra.mxu0 %v1669_v32 }
 0x487   : > { %1514 = vmatprep.subr.bf16.mxu0 %v1848_v0 }
 0x48a   : > { %1515 = vmatpush3.bf16.msra.mxu0 %v1670_v33 }
 0x48b   : > { %1516 = vmatprep.subr.bf16.mxu0 %v1848_v0 }
 0x48e   : > { %1517 = vmatpush3.bf16.msra.mxu0 %v1671_v34 }
 0x48f   : > { %1518 = vmatprep.subr.bf16.mxu0 %v1848_v0 }
 0x492   : > { %1519 = vmatpush3.bf16.msra.mxu0 %v1672_v35 }
 0x493   : > { %1520 = vmatprep.subr.bf16.mxu0 %v1848_v0 }
 0x496   : > { %1521 = vmatpush3.bf16.msra.mxu0 %v1673_v45 }
 0x497   : > { %1522 = vmatprep.subr.bf16.mxu0 %v1848_v0 }
 0x49a   : > { %1523 = vmatpush3.bf16.msra.mxu0 %v1674_v46 }
 0x550   : > { %v779_v37 = vpop.f32.mrb[8].mxu0 }
 0x551   : > { %v780_v38 = vadd.f32 %v1276_v36, %v779_v37  ;;  %v1486_v39 = vpop.f32.mrb[9].mxu0 }
 0x552   : > { %v782_v40 = vpop.f32.mrb[10].mxu0 }
 0x553   : > { %v785_v41 = vmul.f32 0.2, %v780_v38  ;;  %v1487_v42 = vpop.f32.mrb[11].mxu0 }
 0x555   : > { %v786_v43 = vmax.f32 %v780_v38, %v785_v41 }
 0x557   : > { %v788_v44 = vpack.c.bf16 %v786_v43, %v786_v43 }
 0x559   : > { %1505 = vmatmul.mubr.bf16.vlgmr.msra.gmra.mrb[8].mxu1 %v788_v44 }
 0x55a   : > { %1544 = vmatprep.mubr.msk.bf16.mxu1 %vm1849_vm0, %v1848_v0  ;;  %1529 = vmatpush3.bf16.msra.mxu1 %v1675_v47 }
 0x55b   : > { %1530 = vmatprep.subr.bf16.mxu1 %v1848_v0 }
 0x55e   : > { %1531 = vmatpush3.bf16.msra.mxu1 %v1676_v48 }
 0x55f   : > { %1532 = vmatprep.subr.bf16.mxu1 %v1848_v0 }
 0x562   : > { %1533 = vmatpush3.bf16.msra.mxu1 %v1677_v49 }
 0x563   : > { %1534 = vmatprep.subr.bf16.mxu1 %v1848_v0 }
 0x566   : > { %1535 = vmatpush3.bf16.msra.mxu1 %v1678_v50 }
 0x567   : > { %1536 = vmatprep.subr.bf16.mxu1 %v1848_v0 }
 0x56a   : > { %1537 = vmatpush3.bf16.msra.mxu1 %v1679_v51 }
 0x56b   : > { %1538 = vmatprep.subr.bf16.mxu1 %v1848_v0 }
 0x56e   : > { %1539 = vmatpush3.bf16.msra.mxu1 %v1680_v52 }
 0x56f   : > { %1540 = vmatprep.subr.bf16.mxu1 %v1848_v0 }
 0x572   : > { %1541 = vmatpush3.bf16.msra.mxu1 %v1681_v62 }
 0x573   : > { %1542 = vmatprep.subr.bf16.mxu1 %v1848_v0 }
 0x576   : > { %1543 = vmatpush3.bf16.msra.mxu1 %v1682_v63 }
 0x62c   : > { %v892_v54 = vpop.f32.mrb[8].mxu1 }
 0x62d   : > { %v893_v55 = vadd.f32 %v1285_v53, %v892_v54  ;;  %v1506_v56 = vpop.f32.mrb[9].mxu1 }
 0x62e   : > { %v895_v57 = vpop.f32.mrb[10].mxu1 }
 0x62f   : > { %v898_v58 = vmul.f32 0.2, %v893_v55  ;;  %v1507_v59 = vpop.f32.mrb[11].mxu1 }
 0x631   : > { %v899_v60 = vmax.f32 %v893_v55, %v898_v58 }
 0x633   : > { %v901_v61 = vpack.c.bf16 %v899_v60, %v899_v60 }
 0x635   : > { %1525 = vmatmul.mubr.bf16.vlgmr.msra.gmra.mrb[12].mxu0 %v901_v61 }
 0x708   : > { %v1005_v2 = vpop.f32.mrb[12].mxu0 }
 0x709   : > { %v1006_v3 = vadd.f32 %v1294_v1, %v1005_v2  ;;  %v1526_v4 = vpop.f32.mrb[13].mxu0 }
 0x70a   : > { %v1008_v5 = vpop.f32.mrb[14].mxu0 }
 0x70b   : > { %v1011_v6 = vmul.f32 0.2, %v1006_v3  ;;  %v1527_v7 = vpop.f32.mrb[15].mxu0 }
 0x70d   : > { %v1012_v8 = vmax.f32 %v1006_v3, %v1011_v6 }
 0x70f   : > { %v1014_v9 = vpack.c.bf16 %v1012_v8, %v1012_v8 }
 0x711   : > { %1545 = vmatmul.mubr.bf16.vlgmr.msra.gmra.mrb[12].mxu1 %v1014_v9 }
 0x7e4   : > { %v1118_v0 = vpop.f32.mrb[12].mxu1 }
 0x7e5   : > { %v1119_v11 = vadd.f32 %v1303_v10, %v1118_v0  ;;  %v1546_v12 = vpop.f32.mrb[13].mxu1 }
 0x7e6   : > { %v1121_v13 = vpop.f32.mrb[14].mxu1 }
 0x7e7   : > { %1124 = vst [vmem:[%s212_s20] sm:$0xff] %v1119_v11  ;;  %v1547_v14 = vpop.f32.mrb[15].mxu1 }
 0x7e8   : > { %1784 = shalt.err (!%p1781_p2)
}
 0x7e9   : > { %s1785_s8 = scalar_lea.hbm %s2140_s27, 128  ;;  %s1789_s10 = scalar_lea.hbm %s2187_s3, 256 }
 0x7ea   : > { %p1786_p13 = scmp.ne.s32.totalorder %s2140_s27, %s1785_s8  ;;  %p1790_p4 = scmp.lt.u32.totalorder %s2140_s27, %s2187_s3 }
 0x7eb   : > { %p1791_p5 = scmp.lt.u32.totalorder %s1789_s10, %s1785_s8  ;;  %p1793_p11 = scmp.lt.u32.totalorder %s1785_s8, %s2140_s27 }
 0x7ec   : > { %p1787_p6 = pnand %p1786_p13, %p2201_p0 }
 0x7ed   : > { %p1792_p8 = por %p1791_p5, %p1790_p4 }
 0x7ee   : > { %p1788_p10 = pneg %p1787_p6 }
 0x7ef   : > { %p1794_p1 = por %p1793_p11, %p1792_p8 }
 0x7f1   : > { %p1795_p3 = pnand %p1794_p1, %p1788_p10 }
 0x7f3   : > { %1798 = shalt.err (!%p1795_p3)
}
 0x7f4   : > { %1558 = dma.vmem_to_hbm [thread:$0]  (%p2201_p0), %s2142_s17, 128, %s2140_s27, %s1126_s16  }
 0x7f5 PF: > { %s1151_s28 = sand.u32 1, %s1829_s12   ;;  %p2202_p7 = scmp.ne.s32.totalorder %s2192_s19, 0 }
 0x7f6   : > { %p2203_p9 = scmp.ge.s32.totalorder %s1841_s15, 2  ;;  %s1152_s22 = scalar_lea.sflag [#allocation4], %s1151_s28 }
 0x7f8   : > { %p1572_p12 = pnand %p2203_p9, %p2202_p7 }
 0x7fa   : > { %1824 = dma.done.wait (!%p1572_p12), %s1152_s22, 128  }
 0x7fb   : > { %1826 = vsyncadd (!%p1572_p12), %s1152_s22, 4294967168  ;;  %p17_p2 = scmp.ge.s32.totalorder %s1981_s4, 4   ;;  %s2204_s12 = smov %s1833_s13 }
 0x7fc   : > { %s2205_s13 = smov %s1837_s14  ;;  %s2206_s14 = smov %s1997_s7 }
 0x7fd   : > { %s2207_s15 = smov %s1981_s4  ;;  %19 = sbr.rel (!%p17_p2) target bundleno = 6 (0x6), region = 92 }
 0x804   :  { %1157 = vsyncpa [#allocation3], 1 }
 0x805   :  { %1159 = vsyncpa [#allocation3 + $0x1], 1 }
 0x806   :  { %1160 = vsyncpa [#allocation6], 1 }
 0x807   :  { %1161 = vsyncpa [#allocation4], 1 }
 0x808   :  { %1163 = vsyncpa [#allocation4 + $0x1], 1 }

</bundles_post_ra>
